<compile_context>
chip_gen: v5e
topology: v5e:2x2
jax: 0.10.0
libtpu: 0.0.40
codegen_flags: <defaults>
</compile_context>

<pallas_src>
import math

import numpy as np
import jax
import jax.numpy as jnp
from jax import lax
from jax.experimental import pallas as pl
from jax.experimental.pallas import tpu as pltpu

_INV_SQRT_2PI = float(1.0 / math.sqrt(2.0 * math.pi))
_INV_SQRT_2 = float(1.0 / math.sqrt(2.0))
_LANE = 128


def gaussian_upsampling_kernel(params_ref, enc_ref, out_ref, attn_ref):
    # params_ref : (1, N, 4)  columns: [c, 1/(s*sqrt(2)), 1/(s*sqrt(2*pi)), 0]
    #              (masked tokens have columns 1 and 2 zeroed on the host)
    # enc_ref    : (1, N, Hp)
    # out_ref    : (1, tT, Hp)
    # attn_ref   : (1, N, tT)
    N = attn_ref.shape[1]
    tT = attn_ref.shape[2]

    p = params_ref[0]                       # (N, 4)
    c = p[:, 0:1]                           # (N, 1)  token centers
    inv_s2 = p[:, 1:2]                      # (N, 1)  1/(s*sqrt(2)), 0 if masked
    coef = p[:, 2:3]                        # (N, 1)  1/(s*sqrt(2pi)), 0 if masked

    # frame positions for this T-tile: t = t0+1 .. t0+tT
    t0f = (pl.program_id(1) * tT).astype(jnp.float32)
    t_idx = lax.broadcasted_iota(jnp.int32, (N, tT), 1)
    t_vals = t_idx.astype(jnp.float32) + (t0f + 1.0)          # (N, tT)

    # Gaussian pdf with mask + 0.5 folded into the host-side coefficients:
    #   w = exp(-0.5*((t-c)/s)^2) / (s*sqrt(2pi))   and   w = 0 on masked rows
    z = (t_vals - c) * inv_s2
    w = jnp.exp(-(z * z)) * coef                              # (N, tT)

    # normalize over the token axis (per frame); exact reciprocal (tiny vec)
    denom = jnp.sum(w, axis=0, keepdims=True) + 1e-8          # (1, tT)
    attn = w * pl.reciprocal(denom)                           # (N, tT)
    attn_ref[0] = attn.astype(attn_ref.dtype)

    # out = attn^T @ encoder_outputs; transpose fused into the MXU contraction
    # (bf16 operands, f32 accumulation).
    out = lax.dot_general(
        attn.astype(jnp.bfloat16),
        enc_ref[0].astype(jnp.bfloat16),
        dimension_numbers=(((0,), (0,)), ((), ())),           # contract token axis
        preferred_element_type=jnp.float32)                   # (tT, Hp)
    out_ref[0] = out.astype(out_ref.dtype)


def gaussian_upsampling(encoder_outputs, duration, range_param, mask, T,
                        *, tile_t=512, attn_dtype=jnp.float32):
    """Pallas wrapper. T (max total duration) must be a Python int (host side).

    out dtype follows encoder_outputs.dtype; pass bf16 encoder_outputs and/or
    attn_dtype=jnp.bfloat16 to halve the HBM write traffic (documented
    precision trade-off for consumers of out/attn).
    """
    B, N, H = encoder_outputs.shape

    # --- hoisted per-token precompute (B*N elements, essentially free) ------
    dur = duration.astype(jnp.float32)
    c = jnp.cumsum(dur, axis=-1) - 0.5 * dur                  # (B, N) centers
    m = mask.astype(jnp.bool_)
    inv_s = 1.0 / range_param.astype(jnp.float32)             # (B, N)
    # Sanitize masked tokens HERE (range_param may be 0/undefined on padding);
    # this replaces the in-kernel jnp.where and the explicit -0.5 multiply.
    inv_s_scaled = jnp.where(m, 0.0, inv_s * _INV_SQRT_2)     # 1/(s*sqrt(2))
    coef = jnp.where(m, 0.0, inv_s * _INV_SQRT_2PI)           # 1/(s*sqrt(2pi))
    zeros = jnp.zeros_like(c)
    params = jnp.stack([c, inv_s_scaled, coef, zeros], axis=-1)  # (B, N, 4)

    # --- lane-dense padding of H and T, T-tile sizing -----------------------
    H_pad = ((H + _LANE - 1) // _LANE) * _LANE
    tile_t = max(_LANE, (int(tile_t) // _LANE) * _LANE)
    tile_t = min(tile_t, ((T + _LANE - 1) // _LANE) * _LANE)
    if B == 1 and tile_t > _LANE:
        # v7x megacore: ensure >= 2 parallel grid steps when B == 1.
        half = ((T + 2 * _LANE - 1) // (2 * _LANE)) * _LANE
        tile_t = max(_LANE, min(tile_t, half))
    T_pad = ((T + tile_t - 1) // tile_t) * tile_t
    n_t_tiles = T_pad // tile_t

    enc_p = encoder_outputs
    if H_pad != H:
        enc_p = jnp.pad(encoder_outputs, ((0, 0), (0, 0), (0, H_pad - H)))

    out_dtype = encoder_outputs.dtype
    out_bytes = jnp.dtype(out_dtype).itemsize
    attn_bytes = jnp.dtype(attn_dtype).itemsize
    enc_bytes = jnp.dtype(enc_p.dtype).itemsize

    # --- explicit VMEM budget (sized for the tiles actually used) -----------
    # 2x double-buffered out/attn tiles + resident enc block + params slab
    # + f32 intermediates (t_vals / z / w), then 2x headroom, clamped to the
    # v7x-safe 64 MiB physical ceiling.
    tile_bytes = (2 * tile_t * H_pad * out_bytes
                  + 2 * N * tile_t * attn_bytes
                  + 2 * N * H_pad * enc_bytes
                  + 2 * N * _LANE * 4
                  + 3 * N * tile_t * 4)
    vmem_limit = int(min(64 << 20, max(16 << 20, 2 * tile_bytes)))

    out_shapes = (
        jax.ShapeDtypeStruct((B, T_pad, H_pad), out_dtype),
        jax.ShapeDtypeStruct((B, N, T_pad), attn_dtype),
    )

    grid_spec = pltpu.PrefetchScalarGridSpec(
        num_scalar_prefetch=0,
        grid=(B, n_t_tiles),
        in_specs=[
            # params and encoder are constant along the T axis -> stay resident
            pl.BlockSpec((1, N, 4), lambda b, t: (b, 0, 0)),
            pl.BlockSpec((1, N, H_pad), lambda b, t: (b, 0, 0)),
        ],
        out_specs=(
            pl.BlockSpec((1, tile_t, H_pad), lambda b, t: (b, t, 0)),
            pl.BlockSpec((1, N, tile_t), lambda b, t: (b, 0, t)),
        ),
    )

    out_full, attn_full = pl.pallas_call(
        gaussian_upsampling_kernel,
        out_shape=out_shapes,
        grid_spec=grid_spec,
        compiler_params=pltpu.CompilerParams(
            dimension_semantics=("parallel", "parallel"),
            vmem_limit_bytes=vmem_limit),
    )(params, enc_p)

    # strip padding (padded-tail frames / H columns are discarded here)
    return out_full[:, :T, :H], attn_full[:, :, :T]


def gaussian_upsampling_reference(encoder_outputs, duration, range_param, mask, T):
    """Pure-JAX reference matching the PyTorch forward exactly."""
    dur = duration.astype(jnp.float32)
    e = jnp.cumsum(dur, axis=-1)
    c = e - 0.5 * dur                                         # [B, N]
    t = jnp.arange(1, T + 1, dtype=jnp.float32)[None, None, :]  # [1, 1, T]
    s = range_param.astype(jnp.float32)[..., None]            # [B, N, 1]
    z = (t - c[..., None]) / s
    w = jnp.exp(-0.5 * z * z) / (s * jnp.sqrt(2.0 * jnp.pi))  # [B, N, T]
    w = jnp.where(mask[..., None], 0.0, w)
    attn = w / (jnp.sum(w, axis=1, keepdims=True) + 1e-8)
    out = jnp.einsum('bnt,bnh->bth', attn, encoder_outputs)
    return out, attn


if __name__ == "__main__":
    key = jax.random.PRNGKey(0)
    k1, k2, k3 = jax.random.split(key, 3)

    B, N, H = 2, 8, 32

    # integer-valued durations (as floats), like a duration predictor output
    duration = jax.random.randint(k1, (B, N), 1, 7).astype(jnp.float32)
    # second batch item has 2 padded tokens
    lengths = jnp.array([N, N - 2])
    mask = jnp.arange(N)[None, :] >= lengths[:, None]         # True = padded
    duration = jnp.where(mask, 0.0, duration)

    range_param = jax.random.uniform(k2, (B, N), minval=0.5, maxval=2.0,
                                     dtype=jnp.float32)
    encoder_outputs = jax.random.normal(k3, (B, N, H), dtype=jnp.float32)

    # TODO(synk): T = max total duration is data-dependent in PyTorch
    # (torch.max(t).item()); it is computed on the host here since Pallas/JAX
    # needs static output shapes.
    T = int(np.max(np.asarray(jnp.sum(duration, axis=-1))))

    out, attn = gaussian_upsampling(encoder_outputs, duration, range_param,
                                    mask, T)
    jax.block_until_ready((out, attn))

    out_ref, attn_ref = gaussian_upsampling_reference(
        encoder_outputs, duration, range_param, mask, T)

    assert out.shape == (B, T, H) and attn.shape == (B, N, T)
    # attn is now exact-reciprocal f32 (tight); out tolerance accounts for the
    # bf16 MXU operands (deliberate trade-off, f32 accumulation).
    assert np.allclose(np.asarray(attn), np.asarray(attn_ref),
                       atol=2e-3, rtol=2e-3), "attn mismatch"
    assert np.allclose(np.asarray(out), np.asarray(out_ref),
                       atol=3e-2, rtol=3e-2), "out mismatch"

    print("KERNEL_OK")
</pallas_src>

<mosaic_0001>
module attributes {stable_mosaic.version = 11 : i64} {
  func.func @gaussian_upsampling_kernel(%arg0: i32, %arg1: i32, %arg2: memref<1x8x4xf32, #tpu.memory_space<vmem>>, %arg3: memref<1x8x128xf32, #tpu.memory_space<vmem>>, %arg4: memref<1x128x128xf32, #tpu.memory_space<vmem>>, %arg5: memref<1x8x128xf32, #tpu.memory_space<vmem>>) attributes {dimension_semantics = [#tpu.dimension_semantics<parallel>, #tpu.dimension_semantics<parallel>], iteration_bounds = array<i64: 2, 1>, scalar_prefetch = 0 : i64, scratch_operands = 0 : i64, tpu.core_type = #tpu.core_type<tc>, window_params = [{transform_indices = @transform_0, window_bounds = array<i64: 1, 8, 4>}, {transform_indices = @transform_1, window_bounds = array<i64: 1, 8, 128>}, {transform_indices = @transform_2, window_bounds = array<i64: 1, 128, 128>}, {transform_indices = @transform_3, window_bounds = array<i64: 1, 8, 128>}]} {
    %c0 = arith.constant 0 : index
    %c0_0 = arith.constant 0 : index
    %c0_1 = arith.constant 0 : index
    %0 = vector.load %arg2[%c0, %c0_0, %c0_1] : memref<1x8x4xf32, #tpu.memory_space<vmem>>, vector<1x8x4xf32>
    %1 = vector.shape_cast %0 : vector<1x8x4xf32> to vector<8x4xf32>
    %2 = vector.extract_strided_slice %1 {offsets = [0, 0], sizes = [8, 1], strides = [1, 1]} : vector<8x4xf32> to vector<8x1xf32>
    %3 = vector.extract_strided_slice %1 {offsets = [0, 1], sizes = [8, 1], strides = [1, 1]} : vector<8x4xf32> to vector<8x1xf32>
    %4 = vector.extract_strided_slice %1 {offsets = [0, 2], sizes = [8, 1], strides = [1, 1]} : vector<8x4xf32> to vector<8x1xf32>
    %c128_i32 = arith.constant 128 : i32
    %5 = arith.muli %arg1, %c128_i32 : i32
    %6 = arith.sitofp %5 : i32 to f32
    %7 = tpu.iota {dimensions = array<i32: 1>} : vector<8x128xi32>
    %8 = arith.sitofp %7 : vector<8x128xi32> to vector<8x128xf32>
    %cst = arith.constant 1.000000e+00 : f32
    %9 = arith.addf %6, %cst : f32
    %10 = vector.broadcast %9 : f32 to vector<8x128xf32>
    %11 = arith.addf %8, %10 : vector<8x128xf32>
    %12 = vector.broadcast %2 : vector<8x1xf32> to vector<8x128xf32>
    %13 = arith.subf %11, %12 : vector<8x128xf32>
    %14 = vector.broadcast %3 : vector<8x1xf32> to vector<8x128xf32>
    %15 = arith.mulf %13, %14 : vector<8x128xf32>
    %16 = arith.mulf %15, %15 : vector<8x128xf32>
    %cst_2 = arith.constant 0.000000e+00 : f32
    %17 = vector.broadcast %cst_2 : f32 to vector<8x128xf32>
    %18 = arith.subf %17, %16 : vector<8x128xf32>
    %19 = math.exp %18 : vector<8x128xf32>
    %20 = vector.broadcast %4 : vector<8x1xf32> to vector<8x128xf32>
    %21 = arith.mulf %19, %20 : vector<8x128xf32>
    %cst_3 = arith.constant dense<0.000000e+00> : vector<128xf32>
    %22 = vector.multi_reduction <add>, %21, %cst_3 [0] : vector<8x128xf32> to vector<128xf32>
    %23 = vector.shape_cast %22 : vector<128xf32> to vector<1x128xf32>
    %cst_4 = arith.constant 9.99999993E-9 : f32
    %24 = vector.broadcast %cst_4 : f32 to vector<1x128xf32>
    %25 = arith.addf %23, %24 : vector<1x128xf32>
    %26 = tpu.reciprocal %25 : vector<1x128xf32> -> vector<1x128xf32>
    %27 = vector.broadcast %26 : vector<1x128xf32> to vector<8x128xf32>
    %28 = arith.mulf %21, %27 : vector<8x128xf32>
    %c0_5 = arith.constant 0 : index
    %c0_6 = arith.constant 0 : index
    %c0_7 = arith.constant 0 : index
    %29 = vector.load %arg5[%c0_5, %c0_6, %c0_7] : memref<1x8x128xf32, #tpu.memory_space<vmem>>, vector<1x8x128xf32>
    %30 = vector.shape_cast %29 : vector<1x8x128xf32> to vector<8x128xf32>
    %31 = vector.shape_cast %28 : vector<8x128xf32> to vector<1x8x128xf32>
    tpu.vector_store %arg5[%c0_5, %c0_6, %c0_7], %31 {strides = array<i32>} : memref<1x8x128xf32, #tpu.memory_space<vmem>>, vector<1x8x128xf32>,
    %32 = arith.truncf %28 : vector<8x128xf32> to vector<8x128xbf16>
    %c0_8 = arith.constant 0 : index
    %c0_9 = arith.constant 0 : index
    %c0_10 = arith.constant 0 : index
    %33 = vector.load %arg3[%c0_8, %c0_9, %c0_10] : memref<1x8x128xf32, #tpu.memory_space<vmem>>, vector<1x8x128xf32>
    %34 = vector.shape_cast %33 : vector<1x8x128xf32> to vector<8x128xf32>
    %35 = arith.truncf %34 : vector<8x128xf32> to vector<8x128xbf16>
    %cst_11 = arith.constant dense<0.000000e+00> : vector<128x128xf32>
    %36 = tpu.matmul %32, %35, %cst_11 {dimension_numbers = #tpu.dot_dimension_numbers<[0], [0], [1], [1], [0, 1, 1, 1], [], []>} : vector<8x128xbf16>, vector<8x128xbf16>, vector<128x128xf32> -> vector<128x128xf32>
    %c0_12 = arith.constant 0 : index
    %c0_13 = arith.constant 0 : index
    %c0_14 = arith.constant 0 : index
    %37 = vector.load %arg4[%c0_12, %c0_13, %c0_14] : memref<1x128x128xf32, #tpu.memory_space<vmem>>, vector<1x128x128xf32>
    %38 = vector.shape_cast %37 : vector<1x128x128xf32> to vector<128x128xf32>
    %39 = vector.shape_cast %36 : vector<128x128xf32> to vector<1x128x128xf32>
    tpu.vector_store %arg4[%c0_12, %c0_13, %c0_14], %39 {strides = array<i32>} : memref<1x128x128xf32, #tpu.memory_space<vmem>>, vector<1x128x128xf32>,
    return
  }
  func.func @transform_0(%arg0: i32, %arg1: i32) -> (i32, i32, i32) {
    %c0_i32 = arith.constant 0 : i32
    %c0_i32_0 = arith.constant 0 : i32
    %c0_i32_1 = arith.constant 0 : i32
    return %arg0, %c0_i32, %c0_i32_0 : i32, i32, i32
  }
  func.func @transform_1(%arg0: i32, %arg1: i32) -> (i32, i32, i32) {
    %c0_i32 = arith.constant 0 : i32
    %c0_i32_0 = arith.constant 0 : i32
    %c0_i32_1 = arith.constant 0 : i32
    return %arg0, %c0_i32, %c0_i32_0 : i32, i32, i32
  }
  func.func @transform_2(%arg0: i32, %arg1: i32) -> (i32, i32, i32) {
    %c0_i32 = arith.constant 0 : i32
    %c0_i32_0 = arith.constant 0 : i32
    return %arg0, %arg1, %c0_i32 : i32, i32, i32
  }
  func.func @transform_3(%arg0: i32, %arg1: i32) -> (i32, i32, i32) {
    %c0_i32 = arith.constant 0 : i32
    %c0_i32_0 = arith.constant 0 : i32
    return %arg0, %c0_i32, %arg1 : i32, i32, i32
  }
}

</mosaic_0001>

<bundles_post_ra>
// kernel: tpu_custom_call.1
= control target key start
LH: loop header
LB: loop body
LE: loop exit
PB: predicated region body
PF: predicated region fallthrough
CT: control target
= control target key end

     0   :  { %9 = vsyncpa [#allocation3], 0  ;;  %s919_s0 = inlined_call_operand.vmem [shape: f32[2,8,4], index: 0, kind: input, shape index: {}]   ;;  %s920_s1 = inlined_call_operand.vmem [shape: f32[2,8,128], index: 1, kind: input, shape index: {}]   ;;  %s921_s2 = inlined_call_operand.hbm [shape: f32[2,128,128], index: 2, kind: output, shape index: {0}]   ;;  %s922_s3 = inlined_call_operand.hbm [shape: f32[2,8,128], index: 3, kind: output, shape index: {1}]  }
   0x1   :  { %11 = vsyncpa [#allocation3 + $0x1], 0 }
   0x2   :  { %12 = vsyncpa [#allocation5], 0 }
   0x3   :  { %14 = vsyncpa [#allocation5 + $0x1], 0  ;;  %s772_s12 = smov 0   ;;  %s774_s13 = smov 0  }
   0x4   :  { %s776_s14 = smov 0   ;;  %s778_s15 = smov 0  }
   0x5   :  { %s780_s16 = smov 0   ;;  %s782_s17 = smov 0  }
   0x6 LB: > { %s534_s18 = sadd.s32 4294967295, %s745_s17   ;;  %s535_s19 = sadd.s32 4294967294, %s745_s17   ;;  %s745_s17 = sphi %s782_s17, %s20_s17   ;;  %s741_s16 = sphi %s780_s16, %s929_s16   ;;  %s737_s15 = sphi %s778_s15, %s928_s15   ;;  %s733_s14 = sphi %s776_s14, %s927_s14   ;;  %s729_s13 = sphi %s774_s13, %s926_s13   ;;  %s725_s12 = sphi %s772_s12, %s925_s12  }
   0x7   : > { %s32_s20 = sadd.s32 1, %s741_s16  ;;  %s93_s21 = sadd.s32 1, %s733_s14 }
   0x8   : > { %p34_p0 = scmp.ge.s32.totalorder %s32_s20, 2  ;;  %p103_p1 = scmp.ne.s32.totalorder %s733_s14, %s729_s13 }
   0x9   : > { %p104_p2 = scmp.eq.s32.totalorder %s534_s18, 1  ;;  %p109_p3 = scmp.ne.s32.totalorder %s729_s13, %s725_s12 }
   0xa   : > { %s931_s20 = smov (%p34_p0, %s32_s20), 0  ;;  %p110_p5 = scmp.eq.s32.totalorder %s535_s19, 1 }
   0xb   : > { %p812_p4 = por %p104_p2, %p103_p1  ;;  %s88_s23 = ssub.s32 %s741_s16, %s931_s20 }
   0xc   : > { %p538_p6 = scmp.ge.s32.totalorder %s745_s17, 1  ;;  %p91_p7 = scmp.eq.s32.totalorder %s88_s23, 0 }
   0xd   : > { %p819_p8 = por %p110_p5, %p109_p3  ;;  %p170_p9 = scmp.lt.s32.totalorder %s745_s17, 3 }
   0xe   : > { %s825_s25 = scalar_select %p91_p7, %s733_s14, %s93_s21  }
   0xf   : > { %p171_p10 = pnand %p538_p6, %p170_p9 }
  0x10   : > { %p202_p11 = scmp.lt.s32.totalorder (!%p171_p10), %s737_s15, 1  ;;  %s836_s7 = sand.u32 (!%p171_p10), 1, %s729_s13  }
  0x11   : > { %174 = sbr.rel (%p171_p10) target bundleno = 632 (0x278), region = 28  ;;  %s540_s8 = sshll.u32 (!%p171_p10), %s836_s7, 3 }
  0x12   : > { %s201_s9 = scalar_lea.vmem (!%p171_p10), [#allocation4], %s540_s8  ;;  %s539_s10 = sshll.u32 (!%p171_p10), %s836_s7, 7 }
  0x13   : > { %s555_s11 = sshll.u32 (!%p171_p10), %s737_s15, 3  ;;  %s852_s23 = scalar_lea.vmem (!%p171_p10), [#allocation2], %s539_s10 }
  0x14   : > { %s413_s21 = scalar_lea.hbm (!%p171_p10), %s922_s3, %s555_s11  ;;  %s383_s28 = scalar_lea.sflag (!%p171_p10), [#allocation5], %s836_s7 }
  0x16   : > { %v747_v0 = vmov 0   ;;  %v748_v1 = vmov 2   ;;  %s203_s26 = scalar_select %p202_p11, %s737_s15, 1  ;;  %v749_v3 = vmov 1   ;;  %v215_v4 = vlaneseq }
  0x17   : > { %627 = vset.pattern.permute.xlu0 %v747_v0  ;;  %629 = vset.pattern.permute.xlu1 %v748_v1  ;;  %vm308_vm0 = vcmask 1043456   ;;  %vm283_vm5 = vcmask 64512  }
  0x18   : > { %s541_s27 = sshll.u32 %s203_s26, 3  ;;  %v216_v5 = vand.u32 127, %v215_v4  ;;  %s415_s26 = sshll.u32 %s201_s9, 4  ;;  %s416_s26 = int_to_ptr.vmem [resolvable:$true] %s415_s26 }
  0x19   : > { %s205_s30 = scalar_lea.vmem %s919_s0, %s541_s27  ;;  %s209_s6 = scalar_lea.vmem %s920_s1, %s541_s27 }
  0x1a   : > { %v212_v2 = vld [vmem:[%s205_s30] sm:$0xff]  ;;  %v217_v6 = vcvt.s32.f32 %v216_v5  ;;  %s417_s27 = sshll.u32 %s413_s21, 4  ;;  %s418_s27 = int_to_ptr.hbm [resolvable:$true] %s417_s27 }
  0x1b   : > { %223 = vperm.xlu0 %627, %v212_v2   ;;  %237 = vperm.xlu1 %629, %v212_v2   ;;  %v265_v17 = vld [vmem:[%s209_s6] sm:$0xff]  ;;  %s649_s29 = sshra.s32 %s418_s27, 4  ;;  %s655_s6 = scalar_lea.hbm %s922_s3, 16  ;;  %s650_s29 = int_to_ptr.hbm [resolvable:$true] %s649_s29 }
  0x1c   : > { %v220_v8 = vadd.f32 1.0, %v217_v6  ;;  %v266_v19 = vpack.c.bf16 %v265_v17, %v265_v17  ;;  %s651_s30 = scalar_lea.hbm %s650_s29, 8  ;;  %p656_p1 = scmp.lt.s32.totalorder %s650_s29, %s922_s3 }
  0x1d   : > { %p652_p12 = scmp.ne.s32.totalorder %s650_s29, %s651_s30  ;;  %p657_p2 = scmp.lt.s32.totalorder %s655_s6, %s651_s30 }
  0x1e   : > { %v310_v23 = vsel %vm308_vm0, %v266_v19, 0 }
  0x1f   : > { %319 = vmatpush.bf16.msra.mxu0 %v310_v23  ;;  %559 = vmatpush.bf16.msra.mxu1 %v310_v23  ;;  %p653_p13 = pnand %p652_p12, %p812_p4  ;;  %p658_p3 = por %p657_p2, %p656_p1 }
  0x20   : > { %560 = vmatpush.bf16.msra.mxu2 %v310_v23  ;;  %561 = vmatpush.bf16.msra.mxu3 %v310_v23 }
  0x21   : > { %p654_p0 = pneg %p653_p13 }
  0x23   : > { %628 = vset.pattern.permute.xlu0 %v749_v3  ;;  %p659_p5 = pnand %p658_p3, %p654_p0 }
  0x24   : > { %228 = vperm.xlu0 %628, %v212_v2  }
  0x2c   : > { %630 = vset.pattern.permute.xlu0 %v748_v1 }
  0x8d   : > { %v224_v7 = vpop.permute.xlu0 %223  ;;  %v238_v15 = vpop.permute.xlu1 %237 }
  0x8e   : > { %v226_v9 = vsub.f32 %v220_v8, %v224_v7 }
  0x96   : > { %v229_v10 = vpop.permute.xlu0 %228 }
  0x97   : > { %v231_v11 = vmul.f32 %v229_v10, %v226_v9 }
  0x99   : > { %v232_v12 = vmul.f32 %v231_v11, %v231_v11 }
  0x9b   : > { %v233_v13 = vsub.f32 0.0, %v232_v12 }
  0x9d   : > { %v234_v14 = vmul.f32 1.442695, %v233_v13 }
  0x9f   : > { %631 = vpow2.f32 %v234_v14 }
  0xa5   : > { %v632_v16 = vpop.eup %631 }
  0xa6   : > { %v240_v18 = vmul.f32 %v632_v16, %v238_v15 }
  0xa8   : > { %v241_v20 = vrot.slane %v240_v18, 4 }
  0xaa   : > { %v242_v21 = vadd.f32 %v241_v20, %v240_v18 }
  0xac   : > { %v243_v22 = vrot.slane %v242_v21, 2 }
  0xae   : > { %v244_v24 = vadd.f32 %v243_v22, %v242_v21 }
  0xb0   : > { %v245_v25 = vrot.slane %v244_v24, 1 }
  0xb2   : > { %v246_v26 = vadd.f32 %v245_v25, %v244_v24 }
  0xb4   : > { %v247_v27 = vadd.f32 1e-08, %v246_v26 }
  0xb6   : > { %633 = vrcp.f32 %v247_v27  ;;  %v259_v31 = vand.u32 2147483648, %v247_v27  ;;  %v257_v33 = vand.u32 2147483647, %v247_v27  ;;  %vm253_vm2 = vweird.f32 %v247_v27 }
  0xb8   : > { %v260_v35 = vor.u32 1.1754944e-38, %v259_v31  ;;  %vm258_vm4 = vcmp.eq.f32.partialorder %v257_v33, 8.507059e+37 }
  0xbc   : > { %v634_v28 = vpop.eup %633 }
  0xbd   : > { %v249_v29 = vmul.f32 %v634_v28, %v247_v27  ;;  %vm254_vm1 = vweird.f32 %v634_v28 }
  0xbe   : > { %vm255_vm3 = vmor %vm253_vm2, %vm254_vm1 }
  0xbf   : > { %v250_v30 = vsub.f32 1.0, %v249_v29 }
  0xc1   : > { %v251_v32 = vmul.f32 %v634_v28, %v250_v30 }
  0xc3   : > { %v252_v34 = vadd.f32 %v634_v28, %v251_v32 }
  0xc5   : > { %v256_v36 = vsel %vm255_vm3, %v634_v28, %v252_v34 }
  0xc6   : > { %v261_v37 = vsel %vm258_vm4, %v260_v35, %v256_v36 }
  0xc7   : > { %v262_v38 = vmul.f32 %v261_v37, %v240_v18 }
  0xc9   : > { %v264_v39 = vpack.c.bf16 %v262_v38, %v262_v38  ;;  %263 = vst [vmem:[%s201_s9] sm:$0xff] %v262_v38 }
  0xcb   : > { %267 = vxpose.xlu1.c.b16.start.end [1/1] (short) %v264_v39, 128 }
 0x177   : > { %v275_v40 = vpop.trf.xlu1 }
 0x178   : > { %543 = vmatmul.msk.bf16.vlgmr.msra.gmra.mxu0 %vm283_vm5, %v275_v40 }
 0x187   : > { %v276_v41 = vpop.trf.xlu1 }
 0x188   : > { %544 = vmatmul.msk.bf16.gmra.mxu0 %vm283_vm5, %v276_v41 }
 0x197   : > { %v277_v42 = vpop.trf.xlu1 }
 0x198   : > { %545 = vmatmul.msk.bf16.vlgmr.msra.gmra.mxu1 %vm283_vm5, %v277_v42 }
 0x1a7   : > { %v278_v43 = vpop.trf.xlu1 }
 0x1a8   : > { %546 = vmatmul.msk.bf16.gmra.mxu1 %vm283_vm5, %v278_v43 }
 0x1b7   : > { %v279_v44 = vpop.trf.xlu1 }
 0x1b8   : > { %547 = vmatmul.msk.bf16.vlgmr.msra.gmra.mxu2 %vm283_vm5, %v279_v44 }
 0x1c7   : > { %v280_v45 = vpop.trf.xlu1 }
 0x1c8   : > { %548 = vmatmul.msk.bf16.gmra.mxu2 %vm283_vm5, %v280_v45 }
 0x1d7   : > { %v281_v46 = vpop.trf.xlu1 }
 0x1d8   : > { %549 = vmatmul.msk.bf16.vlgmr.msra.gmra.mxu3 %vm283_vm5, %v281_v46 }
 0x1e7   : > { %v282_v47 = vpop.trf.xlu1 }
 0x1e8   : > { %550 = vmatmul.msk.bf16.gmra.mxu3 %vm283_vm5, %v282_v47 }
 0x1f5   : > { %v321_v48 = vpop.f32.mrf.mxu0 }
 0x1f6   : > { %361 = vst [vmem:[%s852_s23] sm:$0xff] %v321_v48 }
 0x1f7   : > { %662 = shalt.err (!%p659_p5)
}
 0x1f8   : > { %563 = dma.vmem_to_hbm [thread:$0]  (%p812_p4), %s416_s26, 128, %s418_s27, %s383_s28  }
 0x1f9   : > { %s558_s9 = sshll.u32 %s737_s15, 7  ;;  %s397_s21 = sshll.u32 %s852_s23, 4  ;;  %s398_s21 = int_to_ptr.vmem [resolvable:$true] %s397_s21 }
 0x1fa   : > { %s396_s19 = scalar_lea.hbm %s921_s2, %s558_s9  ;;  %s378_s27 = scalar_lea.sflag [#allocation3], %s836_s7 }
 0x1fb   : > { %s399_s26 = sshll.u32 %s396_s19, 4  ;;  %s683_s4 = scalar_lea.hbm %s921_s2, 256  ;;  %s400_s26 = int_to_ptr.hbm [resolvable:$true] %s399_s26 }
 0x1fc   : > { %s677_s28 = sshra.s32 %s400_s26, 4  ;;  %s678_s28 = int_to_ptr.hbm [resolvable:$true] %s677_s28 }
 0x1fd   : > { %v323_v49 = vpop.f32.mrf.mxu0  ;;  %s679_s29 = scalar_lea.hbm %s678_s28, 128  ;;  %p684_p10 = scmp.lt.s32.totalorder %s678_s28, %s921_s2 }
 0x1fe   : > { %362 = vst [vmem:[%s852_s23 + $0x8] sm:$0xff] %v323_v49  ;;  %p680_p6 = scmp.ne.s32.totalorder %s678_s28, %s679_s29  ;;  %p685_p11 = scmp.lt.s32.totalorder %s683_s4, %s679_s29 }
 0x200   : > { %p681_p7 = pnand %p680_p6, %p812_p4  ;;  %p686_p12 = por %p685_p11, %p684_p10 }
 0x202   : > { %p682_p9 = pneg %p681_p7 }
 0x204   : > { %p687_p13 = pnand %p686_p12, %p682_p9 }
 0x205   : > { %v326_v50 = vpop.f32.mrf.mxu0 }
 0x206   : > { %363 = vst [vmem:[%s852_s23 + $0x10] sm:$0xff] %v326_v50 }
 0x20d   : > { %v328_v51 = vpop.f32.mrf.mxu0 }
 0x20e   : > { %364 = vst [vmem:[%s852_s23 + $0x18] sm:$0xff] %v328_v51 }
 0x215   : > { %v331_v52 = vpop.f32.mrf.mxu1 }
 0x216   : > { %365 = vst [vmem:[%s852_s23 + $0x20] sm:$0xff] %v331_v52 }
 0x21d   : > { %v333_v53 = vpop.f32.mrf.mxu1 }
 0x21e   : > { %366 = vst [vmem:[%s852_s23 + $0x28] sm:$0xff] %v333_v53 }
 0x225   : > { %v336_v54 = vpop.f32.mrf.mxu1 }
 0x226   : > { %367 = vst [vmem:[%s852_s23 + $0x30] sm:$0xff] %v336_v54 }
 0x22d   : > { %v338_v55 = vpop.f32.mrf.mxu1 }
 0x22e   : > { %368 = vst [vmem:[%s852_s23 + $0x38] sm:$0xff] %v338_v55 }
 0x23b   : > { %v341_v56 = vpop.f32.mrf.mxu2 }
 0x23c   : > { %369 = vst [vmem:[%s852_s23 + $0x40] sm:$0xff] %v341_v56 }
 0x243   : > { %v343_v57 = vpop.f32.mrf.mxu2 }
 0x244   : > { %370 = vst [vmem:[%s852_s23 + $0x48] sm:$0xff] %v343_v57 }
 0x24b   : > { %v346_v58 = vpop.f32.mrf.mxu2 }
 0x24c   : > { %371 = vst [vmem:[%s852_s23 + $0x50] sm:$0xff] %v346_v58 }
 0x253   : > { %v348_v59 = vpop.f32.mrf.mxu2 }
 0x254   : > { %372 = vst [vmem:[%s852_s23 + $0x58] sm:$0xff] %v348_v59 }
 0x25b   : > { %v351_v60 = vpop.f32.mrf.mxu3 }
 0x25c   : > { %373 = vst [vmem:[%s852_s23 + $0x60] sm:$0xff] %v351_v60 }
 0x263   : > { %v353_v61 = vpop.f32.mrf.mxu3 }
 0x264   : > { %374 = vst [vmem:[%s852_s23 + $0x68] sm:$0xff] %v353_v61 }
 0x26b   : > { %v356_v62 = vpop.f32.mrf.mxu3 }
 0x26c   : > { %375 = vst [vmem:[%s852_s23 + $0x70] sm:$0xff] %v356_v62 }
 0x273   : > { %v358_v63 = vpop.f32.mrf.mxu3 }
 0x274   : > { %376 = vst [vmem:[%s852_s23 + $0x78] sm:$0xff] %v358_v63 }
 0x275   : > { %690 = shalt.err (!%p687_p13)
}
 0x276   : > { %s750_s7 = smov 128   ;;  %s751_s23 = smov 8  }
 0x277   : > { %562 = dma.vmem_to_hbm [thread:$0]  (%p812_p4), %s398_s21, 2048, %s400_s26, %s378_s27, %s750_s7, %s750_s7, %s751_s23  }
 0x278 PF: > { %p573_p0 = scmp.ge.s32.totalorder %s745_s17, 2  ;;  %s429_s8 = sand.u32 1, %s725_s12  }
 0x279   : > { %s430_s10 = scalar_lea.sflag [#allocation3], %s429_s8 }
 0x27a   : > { %p567_p1 = pnand %p573_p0, %p819_p8 }
 0x27c   : > { %p568_p2 = pneg %p567_p1 }
 0x27e   : > { %716 = dma.done.wait (%p568_p2), %s430_s10, 2048  }
 0x27f   : > { %718 = vsyncadd (%p568_p2), %s430_s10, 4294965248  ;;  %s440_s9 = scalar_lea.sflag [#allocation5], %s429_s8 }
 0x280   : > { %720 = dma.done.wait (%p568_p2), %s440_s9, 128  }
 0x281   : > { %722 = vsyncadd (%p568_p2), %s440_s9, 4294967168  ;;  %s20_s17 = sadd.s32 1, %s745_s17   ;;  %s925_s12 = smov %s729_s13 }
 0x282   : > { %p17_p3 = scmp.ge.s32.totalorder %s20_s17, 4   ;;  %s926_s13 = smov %s733_s14 }
 0x283   : > { %s927_s14 = smov %s825_s25  ;;  %s928_s15 = smov %s741_s16 }
 0x284   : > { %s929_s16 = smov %s931_s20  ;;  %19 = sbr.rel (!%p17_p3) target bundleno = 6 (0x6), region = 83 }
 0x289   :  { %446 = vsyncpa [#allocation3], 1 }
 0x28a   :  { %448 = vsyncpa [#allocation3 + $0x1], 1 }
 0x28b   :  { %449 = vsyncpa [#allocation5], 1 }
 0x28c   :  { %451 = vsyncpa [#allocation5 + $0x1], 1 }

</bundles_post_ra>
